<compile_context>
chip_gen: v7x
topology: tpu7x:2x2x1
jax: 0.10.0
libtpu: 0.0.40
codegen_flags: <defaults>
</compile_context>

<pallas_src>
import functools
from typing import Dict, List, Tuple, Union

import jax
import jax.numpy as jnp
from jax.experimental import pallas as pl
from jax.experimental.pallas import tpu as pltpu


def _round_up(x: int, m: int) -> int:
    return ((x + m - 1) // m) * m


# ---------------------------------------------------------------------------
# Generation-aware configuration
# ---------------------------------------------------------------------------
def _choose_hw_config() -> dict:
    try:
        kind = jax.devices()[0].device_kind.lower()
    except Exception:
        kind = ""
    if "v7" in kind:
        # 64 MiB VMEM per TensorCore, 2 TCs/chip, bf16 VPU/EUP.
        return dict(vmem_limit=48 << 20, budget=40 << 20,
                    ew_dtype=jnp.bfloat16, two_cores=True, tm_cap=1024)
    if "v6" in kind:
        # 128 MiB VMEM, bf16 VPU/EUP.
        return dict(vmem_limit=100 << 20, budget=88 << 20,
                    ew_dtype=jnp.bfloat16, two_cores=False, tm_cap=1024)
    if "v5" in kind:
        # v5e/v5p: 128 MiB physical VMEM, no bf16 VPU/EUP -> f32 elementwise.
        return dict(vmem_limit=100 << 20, budget=88 << 20,
                    ew_dtype=jnp.float32, two_cores=False, tm_cap=1024)
    # Unknown generation: conservative budget, f32 elementwise.
    return dict(vmem_limit=48 << 20, budget=40 << 20,
                ew_dtype=jnp.float32, two_cores=False, tm_cap=1024)


# ---------------------------------------------------------------------------
# Pallas kernel: one or two fused MLP stacks (matmul on MXU + bias + tanh)
# ---------------------------------------------------------------------------
def _mlp_kernel(*refs, n_layers: Tuple[int, ...], ew_dtype):
    """refs = (x_ref, [W0, b0, W1, b1, ...] per head ..., out_ref per head)."""
    n_heads = len(n_layers)
    x_ref = refs[0]
    out_refs = refs[len(refs) - n_heads:]
    params = refs[1:len(refs) - n_heads]

    x = x_ref[...]                                    # bf16 (cast in wrapper)
    off = 0
    for head, nl in enumerate(n_layers):
        h = x
        for layer in range(nl):
            w_ref = params[off + 2 * layer]           # [in_pad, out_pad] bf16
            b_ref = params[off + 2 * layer + 1]       # [1, out_pad]  ew_dtype
            # bf16 x bf16 -> f32 accumulation on the MXU.
            acc = jnp.dot(h.astype(w_ref.dtype), w_ref[...],
                          preferred_element_type=jnp.float32)
            # Bias + tanh in ew_dtype (f32 on v5-family, bf16 on v6e/v7x).
            h = jnp.tanh(acc.astype(ew_dtype)
                         + b_ref[...].astype(ew_dtype)).astype(w_ref.dtype)
        off += 2 * nl
        out_refs[head][...] = h.astype(out_refs[head].dtype)


# ---------------------------------------------------------------------------
# Padded parameter-stack construction (done once at init)
# ---------------------------------------------------------------------------
def _build_dense_stack(feat_pad: int, feature_dim: int,
                       params: List[Tuple[jax.Array, jax.Array]],
                       compute_dtype, bias_dtype):
    """One head, each layer width padded up to a multiple of 128 (lane-dense)."""
    stack = []
    in_valid, in_pad = feature_dim, feat_pad
    for w, b in params:
        out = int(w.shape[1])
        out_pad = _round_up(out, 128)
        W = jnp.zeros((in_pad, out_pad), jnp.float32)
        W = W.at[:in_valid, :out].set(w.astype(jnp.float32))
        B = jnp.zeros((1, out_pad), jnp.float32)
        B = B.at[0, :out].set(b.astype(jnp.float32))
        stack.append((W.astype(compute_dtype), B.astype(bias_dtype)))
        in_valid, in_pad = out, out_pad
    return stack


def _build_blockdiag_stack(feat_pad: int, feature_dim: int,
                           pi_params, vf_params, compute_dtype, bias_dtype):
    """Block-diagonal pi+vf stack (only used when out_pi+out_vf <= 128 per layer).

    Layer 0 reads the shared feature vector (weights concatenated along the
    output axis); deeper layers are block-diagonal so the heads never mix.
    Output layout per layer: [pi (out_pi)] [vf (out_vf)] [zero pad to 128].
    """
    stack = []
    in_pi = in_vf = feature_dim
    in_pad = feat_pad
    first = True
    for (w_pi, b_pi), (w_vf, b_vf) in zip(pi_params, vf_params):
        out_pi, out_vf = int(w_pi.shape[1]), int(w_vf.shape[1])
        out_pad = _round_up(out_pi + out_vf, 128)
        W = jnp.zeros((in_pad, out_pad), jnp.float32)
        B = jnp.zeros((1, out_pad), jnp.float32)
        if first:
            W = W.at[:feature_dim, :out_pi].set(w_pi.astype(jnp.float32))
            W = W.at[:feature_dim, out_pi:out_pi + out_vf].set(
                w_vf.astype(jnp.float32))
        else:
            W = W.at[:in_pi, :out_pi].set(w_pi.astype(jnp.float32))
            W = W.at[in_pi:in_pi + in_vf, out_pi:out_pi + out_vf].set(
                w_vf.astype(jnp.float32))
        B = B.at[0, :out_pi].set(b_pi.astype(jnp.float32))
        B = B.at[0, out_pi:out_pi + out_vf].set(b_vf.astype(jnp.float32))
        stack.append((W.astype(compute_dtype), B.astype(bias_dtype)))
        in_pi, in_vf, in_pad = out_pi, out_vf, out_pad
        first = False
    return stack


# ---------------------------------------------------------------------------
# Tile sizing against a generation-aware VMEM budget
# ---------------------------------------------------------------------------
def _pick_tile_m(*, batch: int, feat_pad: int, out_width: int, max_width: int,
                 param_bytes: int, in_itemsize: int, out_itemsize: int,
                 ew_itemsize: int, cfg: dict) -> int:
    sublane = 16                        # bf16 LHS / intermediates sublane pack
    # Default pipeliner double-buffers every input, including the resident
    # (constant index_map) weights -> account 2x.
    # TODO(synk): single-buffer the weight specs (pipeline_mode=pl.Buffered(1))
    # once that path is validated on all target generations.
    resident = 2 * param_bytes
    per_row = (2 * feat_pad * in_itemsize                 # dbl-buffered input
               + 2 * out_width * out_itemsize             # dbl-buffered outputs
               + 3 * max_width * max(ew_itemsize, in_itemsize))  # live interms
    avail = cfg["budget"] - resident
    if avail < per_row * sublane:
        # TODO(synk): stream weight tiles over an extra grid axis when the
        # resident parameters alone exceed the per-core VMEM budget.
        avail = per_row * sublane
    tm = min(cfg["tm_cap"], avail // per_row)
    tm = max(sublane, (tm // sublane) * sublane)
    if cfg["two_cores"]:
        # Keep >= 2 grid steps so the "parallel" axis shards across both TCs.
        half = _round_up(max(1, -(-batch // 2)), sublane)
        tm = min(tm, half)
    tm = min(tm, _round_up(batch, sublane))
    return int(max(sublane, tm))


# ---------------------------------------------------------------------------
# pallas_call wrapper: batch-tiled, weights resident, lane-dense outputs
# ---------------------------------------------------------------------------
def _run_mlp_pallas(features: jax.Array,
                    stacks: List[List[Tuple[jax.Array, jax.Array]]],
                    out_dtype, cfg: dict) -> Tuple[jax.Array, ...]:
    batch, feat_dim = features.shape
    compute_dtype = stacks[0][0][0].dtype
    feat_pad = int(stacks[0][0][0].shape[0])

    # bf16 input stream (halves HBM read bytes vs f32).
    x = features.astype(compute_dtype)
    if feat_pad != feat_dim:
        x = jnp.pad(x, ((0, 0), (0, feat_pad - feat_dim)))

    out_pads = [int(s[-1][0].shape[1]) for s in stacks]
    max_width = max(feat_pad,
                    max(int(w.shape[1]) for s in stacks for w, _ in s))
    param_bytes = int(sum(int(w.size) * w.dtype.itemsize +
                          int(b.size) * b.dtype.itemsize
                          for s in stacks for w, b in s))

    tm = _pick_tile_m(batch=batch, feat_pad=feat_pad,
                      out_width=sum(out_pads), max_width=max_width,
                      param_bytes=param_bytes,
                      in_itemsize=jnp.dtype(compute_dtype).itemsize,
                      out_itemsize=jnp.dtype(out_dtype).itemsize,
                      ew_itemsize=jnp.dtype(cfg["ew_dtype"]).itemsize,
                      cfg=cfg)
    b_pad = _round_up(batch, tm)
    if b_pad != batch:
        x = jnp.pad(x, ((0, b_pad - batch), (0, 0)))

    flat_params: List[jax.Array] = []
    in_specs = [pl.BlockSpec((tm, feat_pad), lambda i: (i, 0))]
    for s in stacks:
        for w, b in s:
            flat_params.append(w)
            flat_params.append(b)
            # Constant index_map -> resident in VMEM across all grid steps.
            in_specs.append(pl.BlockSpec(w.shape, lambda i: (0, 0)))
            in_specs.append(pl.BlockSpec(b.shape, lambda i: (0, 0)))
    out_specs = [pl.BlockSpec((tm, op), lambda i: (i, 0)) for op in out_pads]
    out_shape = tuple(jax.ShapeDtypeStruct((b_pad, op), out_dtype)
                      for op in out_pads)
    n_layers = tuple(len(s) for s in stacks)

    flops = int(2 * b_pad * sum(int(w.shape[0]) * int(w.shape[1])
                                for s in stacks for w, _ in s))
    transcendentals = int(b_pad * sum(int(w.shape[1])
                                      for s in stacks for w, _ in s))
    bytes_accessed = int(int(x.size) * x.dtype.itemsize + param_bytes +
                         b_pad * sum(out_pads) * jnp.dtype(out_dtype).itemsize)

    outs = pl.pallas_call(
        functools.partial(_mlp_kernel, n_layers=n_layers,
                          ew_dtype=cfg["ew_dtype"]),
        out_shape=out_shape,
        grid_spec=pltpu.PrefetchScalarGridSpec(
            num_scalar_prefetch=0,
            grid=(b_pad // tm,),
            in_specs=in_specs,
            out_specs=out_specs,
        ),
        compiler_params=pltpu.CompilerParams(
            dimension_semantics=("parallel",),
            vmem_limit_bytes=int(cfg["vmem_limit"])),
        cost_estimate=pl.CostEstimate(flops=flops,
                                      transcendentals=transcendentals,
                                      bytes_accessed=bytes_accessed),
    )(x, *flat_params)

    if not isinstance(outs, (tuple, list)):
        outs = (outs,)
    if b_pad != batch:
        outs = tuple(o[:batch] for o in outs)
    return tuple(outs)


# ---------------------------------------------------------------------------
# M3MlpExtractor equivalent (parameters built deterministically in-script)
# ---------------------------------------------------------------------------
class M3MlpExtractorPallas:
    """JAX/Pallas port of M3MlpExtractor with activation_fn = nn.Tanh."""

    def __init__(self, feature_dim: int,
                 net_arch: Union[List[int], Dict[str, List[int]]],
                 key: jax.Array, dtype=jnp.float32,
                 compute_dtype=jnp.bfloat16):
        if isinstance(net_arch, dict):
            pi_dims = list(net_arch.get("pi", []))
            vf_dims = list(net_arch.get("vf", []))
        else:
            pi_dims = vf_dims = list(net_arch)
        self.pi_dims, self.vf_dims = pi_dims, vf_dims
        self.feature_dim = feature_dim

        def build(dims, last_dim, key):
            params = []
            for d in dims:
                key, kw, kb = jax.random.split(key, 3)
                # Matches nn.Linear default init: U(-1/sqrt(in), 1/sqrt(in)).
                bound = 1.0 / float(last_dim) ** 0.5
                w = jax.random.uniform(kw, (last_dim, d), dtype,
                                       minval=-bound, maxval=bound)
                b = jax.random.uniform(kb, (d,), dtype,
                                       minval=-bound, maxval=bound)
                params.append((w, b))
                last_dim = d
            return params, last_dim

        key_pi, key_vf = jax.random.split(key)
        self.pi_params, self.latent_dim_pi = build(pi_dims, feature_dim, key_pi)
        self.vf_params, self.latent_dim_vf = build(vf_dims, feature_dim, key_vf)

        self._cfg = _choose_hw_config()
        bias_dtype = self._cfg["ew_dtype"]

        # Pad feature_dim to a 128 multiple only when it is large & awkward.
        if feature_dim % 128 == 0 or feature_dim < 128:
            feat_pad = feature_dim
        else:
            feat_pad = _round_up(feature_dim, 128)
        self._feat_pad = feat_pad

        self._pi_stack = (_build_dense_stack(feat_pad, feature_dim,
                                             self.pi_params, compute_dtype,
                                             bias_dtype)
                          if self.pi_params else None)
        self._vf_stack = (_build_dense_stack(feat_pad, feature_dim,
                                             self.vf_params, compute_dtype,
                                             bias_dtype)
                          if self.vf_params else None)

        # Block-diagonal fusion only pays when every layer's combined width
        # fits in the 128-lane tile (zero pad waste, one MXU matmul / layer).
        use_blockdiag = (bool(pi_dims) and bool(vf_dims)
                         and len(pi_dims) == len(vf_dims)
                         and all(p + v <= 128
                                 for p, v in zip(pi_dims, vf_dims)))
        self._blockdiag_stack = (_build_blockdiag_stack(
            feat_pad, feature_dim, self.pi_params, self.vf_params,
            compute_dtype, bias_dtype) if use_blockdiag else None)

    # -- per-head forwards --------------------------------------------------
    def forward_actor(self, features: jax.Array) -> jax.Array:
        if self._pi_stack is None:          # empty net_arch -> identity
            return features
        (out,) = _run_mlp_pallas(features, [self._pi_stack],
                                 features.dtype, self._cfg)
        if out.shape[1] != self.latent_dim_pi:
            out = out[:, :self.latent_dim_pi]
        return out

    def forward_critic(self, features: jax.Array) -> jax.Array:
        if self._vf_stack is None:          # empty net_arch -> identity
            return features
        (out,) = _run_mlp_pallas(features, [self._vf_stack],
                                 features.dtype, self._cfg)
        if out.shape[1] != self.latent_dim_vf:
            out = out[:, :self.latent_dim_vf]
        return out

    # -- fused forward (both heads in ONE pallas_call) ----------------------
    def __call__(self, features: jax.Array):
        if self._pi_stack is None and self._vf_stack is None:
            return features, features
        if self._pi_stack is None:
            return features, self.forward_critic(features)
        if self._vf_stack is None:
            return self.forward_actor(features), features

        if self._blockdiag_stack is not None:
            (out,) = _run_mlp_pallas(features, [self._blockdiag_stack],
                                     features.dtype, self._cfg)
            pi_w, vf_w = self.pi_dims[-1], self.vf_dims[-1]
            return out[:, :pi_w], out[:, pi_w:pi_w + vf_w]

        pi_out, vf_out = _run_mlp_pallas(
            features, [self._pi_stack, self._vf_stack],
            features.dtype, self._cfg)
        if pi_out.shape[1] != self.latent_dim_pi:
            pi_out = pi_out[:, :self.latent_dim_pi]
        if vf_out.shape[1] != self.latent_dim_vf:
            vf_out = vf_out[:, :self.latent_dim_vf]
        return pi_out, vf_out


# ---------------------------------------------------------------------------
# Pure-JAX f32 reference for correctness check
# ---------------------------------------------------------------------------
def _ref_head(features, params):
    h = features.astype(jnp.float32)
    for w, b in params:
        h = jnp.tanh(h @ w.astype(jnp.float32) + b.astype(jnp.float32))
    return h.astype(features.dtype)


if __name__ == "__main__":
    key = jax.random.PRNGKey(0)
    k_params, k_params2, k_x = jax.random.split(key, 3)

    batch = 8
    feature_dim = 32
    features = jax.random.normal(k_x, (batch, feature_dim), jnp.float32)

    # Case 1: symmetric heads (list shortcut) -> block-diagonal fused kernel.
    ext1 = M3MlpExtractorPallas(feature_dim, [64, 64], k_params)
    pi1, vf1 = ext1(features)
    pi1_sep = ext1.forward_actor(features)
    vf1_sep = ext1.forward_critic(features)

    # Case 2: asymmetric heads -> two dense per-head stacks in one kernel,
    # two lane-dense outputs.
    ext2 = M3MlpExtractorPallas(feature_dim, {"pi": [64, 64], "vf": [128]},
                                k_params2)
    pi2, vf2 = ext2(features)

    jax.block_until_ready((pi1, vf1, pi1_sep, vf1_sep, pi2, vf2))

    def check(name, got, params, latent_dim):
        ref = _ref_head(features, params)
        assert got.shape == (batch, latent_dim), (name, got.shape)
        err = float(jnp.max(jnp.abs(got.astype(jnp.float32)
                                    - ref.astype(jnp.float32))))
        # bf16 weights (and bf16 tanh on v6e/v7x) vs all-f32 reference.
        assert err < 3e-2, (name, err)

    check("pi1", pi1, ext1.pi_params, ext1.latent_dim_pi)
    check("vf1", vf1, ext1.vf_params, ext1.latent_dim_vf)
    check("pi1_sep", pi1_sep, ext1.pi_params, ext1.latent_dim_pi)
    check("vf1_sep", vf1_sep, ext1.vf_params, ext1.latent_dim_vf)
    check("pi2", pi2, ext2.pi_params, ext2.latent_dim_pi)
    check("vf2", vf2, ext2.vf_params, ext2.latent_dim_vf)

    print("KERNEL_OK")
</pallas_src>

<mosaic_0001>
module attributes {stable_mosaic.version = 11 : i64} {
  func.func @_mlp_kernel(%arg0: i32, %arg1: memref<16x32xbf16, #tpu.memory_space<vmem>>, %arg2: memref<32x128xbf16, #tpu.memory_space<vmem>>, %arg3: memref<1x128xf32, #tpu.memory_space<vmem>>, %arg4: memref<128x128xbf16, #tpu.memory_space<vmem>>, %arg5: memref<1x128xf32, #tpu.memory_space<vmem>>, %arg6: memref<16x128xf32, #tpu.memory_space<vmem>>) attributes {dimension_semantics = [#tpu.dimension_semantics<parallel>], iteration_bounds = array<i64: 1>, scalar_prefetch = 0 : i64, scratch_operands = 0 : i64, tpu.core_type = #tpu.core_type<tc>, window_params = [{transform_indices = @transform_0, window_bounds = array<i64: 16, 32>}, {pipeline_mode = #tpu.pipeline_mode<synchronous>, transform_indices = @transform_1, window_bounds = array<i64: 32, 128>}, {pipeline_mode = #tpu.pipeline_mode<synchronous>, transform_indices = @transform_2, window_bounds = array<i64: 1, 128>}, {pipeline_mode = #tpu.pipeline_mode<synchronous>, transform_indices = @transform_3, window_bounds = array<i64: 128, 128>}, {pipeline_mode = #tpu.pipeline_mode<synchronous>, transform_indices = @transform_4, window_bounds = array<i64: 1, 128>}, {transform_indices = @transform_5, window_bounds = array<i64: 16, 128>}]} {
    %c0 = arith.constant 0 : index
    %c0_0 = arith.constant 0 : index
    %0 = vector.load %arg1[%c0, %c0_0] : memref<16x32xbf16, #tpu.memory_space<vmem>>, vector<16x32xbf16>
    %c0_1 = arith.constant 0 : index
    %c0_2 = arith.constant 0 : index
    %1 = vector.load %arg2[%c0_1, %c0_2] : memref<32x128xbf16, #tpu.memory_space<vmem>>, vector<32x128xbf16>
    %cst = arith.constant dense<0.000000e+00> : vector<16x128xf32>
    %2 = tpu.matmul %0, %1, %cst {dimension_numbers = #tpu.dot_dimension_numbers<[1], [0], [0], [1], [0, 0, 1, 1], [], []>} : vector<16x32xbf16>, vector<32x128xbf16>, vector<16x128xf32> -> vector<16x128xf32>
    %c0_3 = arith.constant 0 : index
    %c0_4 = arith.constant 0 : index
    %3 = vector.load %arg3[%c0_3, %c0_4] : memref<1x128xf32, #tpu.memory_space<vmem>>, vector<1x128xf32>
    %4 = vector.broadcast %3 : vector<1x128xf32> to vector<16x128xf32>
    %5 = arith.addf %2, %4 : vector<16x128xf32>
    %6 = math.tanh %5 : vector<16x128xf32>
    %7 = arith.truncf %6 : vector<16x128xf32> to vector<16x128xbf16>
    %c0_5 = arith.constant 0 : index
    %c0_6 = arith.constant 0 : index
    %8 = vector.load %arg4[%c0_5, %c0_6] : memref<128x128xbf16, #tpu.memory_space<vmem>>, vector<128x128xbf16>
    %cst_7 = arith.constant dense<0.000000e+00> : vector<16x128xf32>
    %9 = tpu.matmul %7, %8, %cst_7 {dimension_numbers = #tpu.dot_dimension_numbers<[1], [0], [0], [1], [0, 0, 1, 1], [], []>} : vector<16x128xbf16>, vector<128x128xbf16>, vector<16x128xf32> -> vector<16x128xf32>
    %c0_8 = arith.constant 0 : index
    %c0_9 = arith.constant 0 : index
    %10 = vector.load %arg5[%c0_8, %c0_9] : memref<1x128xf32, #tpu.memory_space<vmem>>, vector<1x128xf32>
    %11 = vector.broadcast %10 : vector<1x128xf32> to vector<16x128xf32>
    %12 = arith.addf %9, %11 : vector<16x128xf32>
    %13 = math.tanh %12 : vector<16x128xf32>
    %14 = arith.truncf %13 : vector<16x128xf32> to vector<16x128xbf16>
    %15 = arith.extf %14 : vector<16x128xbf16> to vector<16x128xf32>
    %c0_10 = arith.constant 0 : index
    %c0_11 = arith.constant 0 : index
    %16 = vector.load %arg6[%c0_10, %c0_11] : memref<16x128xf32, #tpu.memory_space<vmem>>, vector<16x128xf32>
    tpu.vector_store %arg6[%c0_10, %c0_11], %15 {strides = array<i32>} : memref<16x128xf32, #tpu.memory_space<vmem>>, vector<16x128xf32>,
    return
  }
  func.func @transform_0(%arg0: i32) -> (i32, i32) {
    %c0_i32 = arith.constant 0 : i32
    %c0_i32_0 = arith.constant 0 : i32
    return %arg0, %c0_i32 : i32, i32
  }
  func.func @transform_1(%arg0: i32) -> (i32, i32) {
    %c0_i32 = arith.constant 0 : i32
    %c0_i32_0 = arith.constant 0 : i32
    %c0_i32_1 = arith.constant 0 : i32
    return %c0_i32, %c0_i32_0 : i32, i32
  }
  func.func @transform_2(%arg0: i32) -> (i32, i32) {
    %c0_i32 = arith.constant 0 : i32
    %c0_i32_0 = arith.constant 0 : i32
    %c0_i32_1 = arith.constant 0 : i32
    return %c0_i32, %c0_i32_0 : i32, i32
  }
  func.func @transform_3(%arg0: i32) -> (i32, i32) {
    %c0_i32 = arith.constant 0 : i32
    %c0_i32_0 = arith.constant 0 : i32
    %c0_i32_1 = arith.constant 0 : i32
    return %c0_i32, %c0_i32_0 : i32, i32
  }
  func.func @transform_4(%arg0: i32) -> (i32, i32) {
    %c0_i32 = arith.constant 0 : i32
    %c0_i32_0 = arith.constant 0 : i32
    %c0_i32_1 = arith.constant 0 : i32
    return %c0_i32, %c0_i32_0 : i32, i32
  }
  func.func @transform_5(%arg0: i32) -> (i32, i32) {
    %c0_i32 = arith.constant 0 : i32
    %c0_i32_0 = arith.constant 0 : i32
    return %arg0, %c0_i32 : i32, i32
  }
}

</mosaic_0001>

<bundles_post_ra>
// kernel: tpu_custom_call.1
= control target key start
LH: loop header
LB: loop body
LE: loop exit
PB: predicated region body
PF: predicated region fallthrough
CT: control target
= control target key end

     0   :  { %10 = vsyncpa [#allocation3], 0  ;;  %s565_s0 = inlined_call_operand.hbm [shape: bf16[16,32], index: 0, kind: input, shape index: {}]   ;;  %s566_s1 = inlined_call_operand.hbm [shape: bf16[32,128], index: 1, kind: input, shape index: {}]   ;;  %s567_s2 = inlined_call_operand.vmem [shape: f32[1,128], index: 2, kind: input, shape index: {}]   ;;  %s568_s3 = inlined_call_operand.hbm [shape: bf16[128,128], index: 3, kind: input, shape index: {}]   ;;  %s569_s4 = inlined_call_operand.vmem [shape: f32[1,128], index: 4, kind: input, shape index: {}]   ;;  %s570_s5 = inlined_call_operand.hbm [shape: f32[16,128], index: 5, kind: output, shape index: {}]  }
   0x1   :  { %11 = vsyncpa [#allocation6], 0 }
   0x2   :  { %12 = vsyncpa [#allocation4], 0  ;;  %s455_s18 = smov [#allocation5]   ;;  %s456_s20 = smov [#allocation2]  }
   0x3   :  { %s30_s19 = sshll.u32 %s455_s18, 4  ;;  %s18_s21 = sshll.u32 %s456_s20, 4  ;;  %s31_s19 = int_to_ptr.vmem [resolvable:$true] %s30_s19  ;;  %s495_s21 = int_to_ptr.vmem [resolvable:$true] %s18_s21 }
   0x4   :  { %s361_s24 = scalar_lea.hbm %s566_s1, 256 }
   0x5   :  { %p362_p0 = scmp.ne.s32.totalorder %s566_s1, %s361_s24  ;;  %p365_p1 = scmp.lt.u32.totalorder %s361_s24, %s566_s1 }
   0x7   :  { %p367_p2 = pnand %p365_p1, %p362_p0 }
   0x9   :  { %370 = shalt.err (!%p367_p2)
}
   0xa   :  { %s371_s29 = scalar_lea.vmem %s31_s19, 256  ;;  %p376_p4 = scmp.lt.s32.totalorder %s31_s19, %s31_s19 }
   0xb   :  { %p372_p3 = scmp.ne.s32.totalorder %s31_s19, %s371_s29  ;;  %p377_p5 = scmp.lt.s32.totalorder %s371_s29, %s371_s29 }
   0xd   :  { %p378_p6 = por %p377_p5, %p376_p4 }
   0xf   :  { %p379_p7 = pnand %p378_p6, %p372_p3 }
  0x11   :  { %382 = shalt.err (!%p379_p7)
}
  0x12   :  { %s457_s30 = smov 64   ;;  %s458_s6 = smov 4  }
  0x13   :  { %36 = dma.hbm_to_vmem [thread:$0]  %s566_s1, 256, %s31_s19, [#allocation6], %s457_s30, %s457_s30, %s458_s6  }
  0x14   :  { %s383_s11 = scalar_lea.hbm %s565_s0, 128 }
  0x15   :  { %p384_p8 = scmp.ne.s32.totalorder %s565_s0, %s383_s11  ;;  %p387_p9 = scmp.lt.u32.totalorder %s383_s11, %s565_s0 }
  0x17   :  { %p389_p10 = pnand %p387_p9, %p384_p8 }
  0x19   :  { %392 = shalt.err (!%p389_p10)
}
  0x1a   :  { %s393_s16 = scalar_lea.vmem %s495_s21, 128  ;;  %p398_p12 = scmp.lt.s32.totalorder %s495_s21, %s495_s21 }
  0x1b   :  { %p394_p11 = scmp.ne.s32.totalorder %s495_s21, %s393_s16  ;;  %p399_p13 = scmp.lt.s32.totalorder %s393_s16, %s393_s16 }
  0x1d   :  { %p400_p0 = por %p399_p13, %p398_p12 }
  0x1f   :  { %p401_p1 = pnand %p400_p0, %p394_p11 }
  0x21   :  { %404 = shalt.err (!%p401_p1)
}
  0x22   :  { %24 = dma.hbm_to_vmem [thread:$0]  %s565_s0, 128, %s495_s21, [#allocation3], %s457_s30, %s457_s30, %s458_s6  }
  0x23   :  { %s459_s18 = smov [#allocation7]   ;;  %s405_s23 = scalar_lea.hbm %s568_s3, 1024 }
  0x24   :  { %s44_s19 = sshll.u32 %s459_s18, 4  ;;  %p406_p2 = scmp.ne.s32.totalorder %s568_s3, %s405_s23  ;;  %s45_s19 = int_to_ptr.vmem [resolvable:$true] %s44_s19 }
  0x25   :  { %p409_p3 = scmp.lt.u32.totalorder %s405_s23, %s568_s3 }
  0x27   :  { %p411_p4 = pnand %p409_p3, %p406_p2 }
  0x29   :  { %414 = shalt.err (!%p411_p4)
}
  0x2a   :  { %s415_s28 = scalar_lea.vmem %s45_s19, 1024  ;;  %p420_p6 = scmp.lt.s32.totalorder %s45_s19, %s45_s19 }
  0x2b   :  { %p416_p5 = scmp.ne.s32.totalorder %s45_s19, %s415_s28  ;;  %p421_p7 = scmp.lt.s32.totalorder %s415_s28, %s415_s28 }
  0x2d   :  { %p422_p8 = por %p421_p7, %p420_p6 }
  0x2f   :  { %p423_p9 = pnand %p422_p8, %p416_p5 }
  0x31   :  { %426 = shalt.err (!%p423_p9)
}
  0x32   :  { %50 = dma.hbm_to_vmem [thread:$0]  %s568_s3, 1024, %s45_s19, [#allocation6], %s457_s30, %s457_s30, %s458_s6  }
  0x33   :  { %449 = dma.done.wait [#allocation3], 128  }
  0x34   :  { %450 = vsyncadd [#allocation3], 4294967168 }
  0x35   :  { %451 = dma.done.wait [#allocation6], 1280  }
  0x36   :  { %452 = vsyncadd [#allocation6], 4294966016  ;;  %v460_v0 = vmov 0.0   ;;  %vm461_vm0 = vmmov 0   ;;  %v342_v1 = vld [vmem:[#allocation5] sm:$0xff]   ;;  %v343_v2 = vld [vmem:[#allocation5 + $0x8] sm:$0xff]  }
  0x37   :  { %304 = vmatprep.subr.bf16.mxu0 %v460_v0  ;;  %308 = vmatprep.mubr.msk.bf16.mxu0 %vm461_vm0, %v460_v0  ;;  %v345_v3 = vld [vmem:[#allocation7] sm:$0xff]   ;;  %v344_v4 = vld [vmem:[#allocation2] sm:$0xff]   ;;  %vm93_vm1 = vcmask 261120   ;;  %v347_v6 = vld [vmem:[#allocation7 + $0x10] sm:$0xff]  }
  0x38   :  { %312 = vmatprep.subr.bf16.mxu1 %v460_v0  ;;  %328 = vmatprep.mubr.msk.bf16.mxu1 %vm461_vm0, %v460_v0  ;;  %v346_v5 = vld [vmem:[#allocation7 + $0x8] sm:$0xff]   ;;  %v348_v7 = vld [vmem:[#allocation7 + $0x18] sm:$0xff]   ;;  %v349_v8 = vld [vmem:[#allocation7 + $0x20] sm:$0xff]  }
  0x39   :  { %305 = vmatpush3.bf16.msra.mxu0 %v342_v1  ;;  %313 = vmatpush3.bf16.msra.mxu1 %v345_v3  ;;  %v350_v9 = vld [vmem:[#allocation7 + $0x28] sm:$0xff]   ;;  %v351_v10 = vld [vmem:[#allocation7 + $0x30] sm:$0xff]   ;;  %v352_v11 = vld [vmem:[#allocation7 + $0x38] sm:$0xff]  }
  0x3a   :  { %306 = vmatprep.subr.bf16.mxu0 %v460_v0  ;;  %314 = vmatprep.subr.bf16.mxu1 %v460_v0  ;;  %v278_v12 = vld [vmem:[%s567_s2] ss:$0 sm:$0xff]  ;;  %s462_s2 = smov [#allocation8]  }
  0x3b   :  { %v283_v22 = vld [vmem:[%s569_s4] ss:$0 sm:$0xff]  ;;  %s265_s7 = sshll.u32 %s462_s2, 4  ;;  %s266_s7 = int_to_ptr.vmem [resolvable:$true] %s265_s7 }
  0x3c   :  { %s427_s8 = scalar_lea.vmem %s266_s7, 256  ;;  %p432_p11 = scmp.lt.s32.totalorder %s266_s7, %s266_s7 }
  0x3d   :  { %307 = vmatpush3.bf16.msra.mxu0 %v343_v2  ;;  %315 = vmatpush3.bf16.msra.mxu1 %v346_v5  ;;  %p428_p10 = scmp.ne.s32.totalorder %s266_s7, %s427_s8  ;;  %p433_p12 = scmp.lt.s32.totalorder %s427_s8, %s427_s8 }
  0x3e   :  { %316 = vmatprep.subr.bf16.mxu1 %v460_v0 }
  0x3f   :  { %p434_p13 = por %p433_p12, %p432_p11 }
  0x40   :  { %309 = vmatmul.mubr.msk.bf16.vlgmr.msra.gmra.mrb[0].mxu0 %vm93_vm1, %v344_v4 }
  0x41   :  { %317 = vmatpush3.bf16.msra.mxu1 %v347_v6  ;;  %p435_p0 = pnand %p434_p13, %p428_p10 }
  0x42   :  { %318 = vmatprep.subr.bf16.mxu1 %v460_v0 }
  0x45   :  { %319 = vmatpush3.bf16.msra.mxu1 %v348_v7 }
  0x46   :  { %320 = vmatprep.subr.bf16.mxu1 %v460_v0 }
  0x49   :  { %321 = vmatpush3.bf16.msra.mxu1 %v349_v8 }
  0x4a   :  { %322 = vmatprep.subr.bf16.mxu1 %v460_v0 }
  0x4d   :  { %323 = vmatpush3.bf16.msra.mxu1 %v350_v9 }
  0x4e   :  { %324 = vmatprep.subr.bf16.mxu1 %v460_v0 }
  0x51   :  { %325 = vmatpush3.bf16.msra.mxu1 %v351_v10 }
  0x52   :  { %326 = vmatprep.subr.bf16.mxu1 %v460_v0 }
  0x55   :  { %327 = vmatpush3.bf16.msra.mxu1 %v352_v11 }
 0x113   :  { %v131_v13 = vpop.f32.mrb[0].mxu0 }
 0x114   :  { %v132_v14 = vadd.f32 %v278_v12, %v131_v13  ;;  %v310_v15 = vpop.f32.mrb[1].mxu0 }
 0x115   :  { %v134_v16 = vpop.f32.mrb[2].mxu0 }
 0x116   :  { %v135_v17 = vadd.f32 %v278_v12, %v134_v16  ;;  %v311_v18 = vpop.f32.mrb[3].mxu0  ;;  %353 = vtanh.f32 %v132_v14 }
 0x118   :  { %355 = vtanh.f32 %v135_v17 }
 0x120   :  { %v354_v19 = vpop.eup %353 }
 0x122   :  { %v356_v20 = vpop.eup %355 }
 0x123   :  { %v140_v21 = vpack.c.bf16 %v356_v20, %v354_v19 }
 0x125   :  { %329 = vmatmul.mubr.bf16.vlgmr.msra.gmra.mrb[0].mxu1 %v140_v21 }
 0x1f8   :  { %v246_v23 = vpop.f32.mrb[0].mxu1 }
 0x1f9   :  { %v247_v24 = vadd.f32 %v283_v22, %v246_v23  ;;  %v330_v25 = vpop.f32.mrb[1].mxu1 }
 0x1fa   :  { %v249_v26 = vpop.f32.mrb[2].mxu1 }
 0x1fb   :  { %v250_v27 = vadd.f32 %v283_v22, %v249_v26  ;;  %v331_v28 = vpop.f32.mrb[3].mxu1  ;;  %357 = vtanh.f32 %v247_v24 }
 0x1fd   :  { %359 = vtanh.f32 %v250_v27 }
 0x205   :  { %v358_v29 = vpop.eup %357 }
 0x207   :  { %v360_v30 = vpop.eup %359 }
 0x208   :  { %v255_v31 = vpack.c.bf16 %v360_v30, %v358_v29 }
 0x20a   :  { %v256_v32 = vunpack.c.l.bf16 %v255_v31  ;;  %v257_v33 = vunpack.c.h.bf16 %v255_v31 }
 0x20c   :  { %258 = vst [vmem:[#allocation8] sm:$0xff] %v256_v32  ;;  %259 = vst [vmem:[#allocation8 + $0x8] sm:$0xff] %v257_v33 }
 0x20d   :  { %438 = shalt.err (!%p435_p0)
}
 0x20e   :  { %s439_s10 = scalar_lea.hbm %s570_s5, 256 }
 0x20f   :  { %p440_p1 = scmp.ne.s32.totalorder %s570_s5, %s439_s10  ;;  %p443_p2 = scmp.lt.u32.totalorder %s439_s10, %s570_s5 }
 0x211   :  { %p445_p3 = pnand %p443_p2, %p440_p1 }
 0x213   :  { %448 = shalt.err (!%p445_p3)
}
 0x214   :  { %s463_s15 = smov 128   ;;  %s464_s16 = smov 8  }
 0x215   :  { %271 = dma.vmem_to_hbm [thread:$0]  %s266_s7, 256, %s570_s5, [#allocation4], %s463_s15, %s463_s15, %s464_s16  }
 0x216   :  { %453 = dma.done.wait [#allocation4], 256  }
 0x217   :  { %454 = vsyncadd [#allocation4], 4294967040 }
 0x218   :  { %275 = vsyncpa [#allocation3], 1 }
 0x219   :  { %276 = vsyncpa [#allocation6], 1 }
 0x21a   :  { %277 = vsyncpa [#allocation4], 1 }

</bundles_post_ra>
